<compile_context>
chip_gen: v6e
topology: v6e:2x2x1
jax: 0.10.0
libtpu: 0.0.40
codegen_flags: <defaults>
</compile_context>

<pallas_src>
import functools

import jax
import jax.numpy as jnp
from jax import lax
from jax.experimental import pallas as pl
from jax.experimental.pallas import tpu as pltpu

HIDDEN = 32
LANE = 128


def _grl_kernel(n_actions, x_ref, adj_ref, w_ref, b_ref, wo_ref, out_ref):
    f32 = jnp.float32
    relu = lambda z: jnp.maximum(z, 0.0)
    dn_lead = (((0,), (0,)), ((), ()))  # contract leading axes (no transpose needed)

    x = x_ref[...]
    n, f_in = x.shape
    H = HIDDEN

    def w(i):  # i-th (32,32) weight block after we1 (static slice of the packed slab, zero-cost)
        return w_ref[pl.ds(f_in + i * H, H), :]

    def b(i):  # i-th (1,32) bias row
        return b_ref[pl.ds(i, 1), :]

    # --- encoders --------------------------------------------------------------
    h = relu(jnp.dot(x, w_ref[pl.ds(0, f_in), :], preferred_element_type=f32) + b(0))
    h = relu(jnp.dot(h, w(0), preferred_element_type=f32) + b(1))

    # --- GCNConv (dense_to_sparse + gcn_norm equivalent, no in-kernel transpose) ---
    adj = adj_ref[...]
    r_idx = lax.broadcasted_iota(jnp.int32, (n, n), 0)
    c_idx = lax.broadcasted_iota(jnp.int32, (n, n), 1)
    # Â: 1 where an edge exists (dense weights discarded, as in the torch code) or self-loop.
    a_hat = jnp.where((adj != 0.0) | (r_idx == c_idx), 1.0, 0.0).astype(f32)
    # In-degree (column sums of Â) as a (N,1) column via a leading-axis contraction.
    ones_col = jnp.ones((n, 1), f32)
    deg = lax.dot_general(a_hat, ones_col, dimension_numbers=dn_lead,
                          preferred_element_type=f32)          # (N, 1)
    dis = lax.rsqrt(deg)                                        # D^{-1/2}, deg >= 1 (self loops)

    y = jnp.dot(h, w(1), preferred_element_type=f32)            # X W (lin first)
    # agg[i,:] = sum_j a_hat[j,i] * dis[j] * y[j,:]
    agg = lax.dot_general(a_hat, dis * y, dimension_numbers=dn_lead,
                          preferred_element_type=f32)
    xg = relu(dis * agg + b(2))
    xg = relu(jnp.dot(xg, w(2), preferred_element_type=f32) + b(3))

    # --- policy head (concat-free: wp1 split into xg / h halves) -----------------
    p = relu(jnp.dot(xg, w(3), preferred_element_type=f32)
             + jnp.dot(h, w(4), preferred_element_type=f32) + b(4))
    p = relu(jnp.dot(p, w(5), preferred_element_type=f32) + b(5))

    # --- fused output heads (lane-dense): [ V | Mu | exp(2*(p@wmd+bmd)) | 0-pad ] --
    raw = (jnp.dot(p, wo_ref[pl.ds(0, H), :], preferred_element_type=f32)
           + wo_ref[pl.ds(H, 1), :])
    col = lax.broadcasted_iota(jnp.int32, raw.shape, 1)
    # exp on the zero-padded lanes yields 1.0; those lanes are sliced off wrapper-side.
    out_ref[...] = jnp.where(col >= 1 + n_actions, jnp.exp(raw), raw)


def init_params(key, n_features, n_actions):
    diag_size = n_actions * (n_actions + 1) // 2

    def lin(k, fan_in, fan_out, scale=0.1):
        kw, kb = jax.random.split(k)
        w = scale * jax.random.normal(kw, (fan_in, fan_out), jnp.float32)   # (in, out)
        b = scale * jax.random.normal(kb, (1, fan_out), jnp.float32)
        return w, b

    ks = jax.random.split(key, 9)
    p = {}
    p["we1"], p["be1"] = lin(ks[0], n_features, HIDDEN)
    p["we2"], p["be2"] = lin(ks[1], HIDDEN, HIDDEN)
    p["wg"],  p["bg"]  = lin(ks[2], HIDDEN, HIDDEN)
    p["wgd"], p["bgd"] = lin(ks[3], HIDDEN, HIDDEN)
    p["wp1"], p["bp1"] = lin(ks[4], 2 * HIDDEN, HIDDEN)
    p["wp2"], p["bp2"] = lin(ks[5], HIDDEN, HIDDEN)
    p["wv"],  p["bv"]  = lin(ks[6], HIDDEN, 1)
    p["wa"],  p["ba"]  = lin(ks[7], HIDDEN, n_actions)
    p["wmd"], p["bmd"] = lin(ks[8], HIDDEN, diag_size)
    return p


def _pack_params(params):
    """Pack the 18 parameter arrays into 3 slabs (done once, wrapper-side)."""
    wp1 = params["wp1"]
    w_main = jnp.concatenate(
        [params["we1"], params["we2"], params["wg"], params["wgd"],
         wp1[:HIDDEN, :], wp1[HIDDEN:, :], params["wp2"]], axis=0)          # (F+6*32, 32)
    b_main = jnp.concatenate(
        [params["be1"], params["be2"], params["bg"], params["bgd"],
         params["bp1"], params["bp2"]], axis=0)                             # (6, 32)
    # Output heads fused; exp(z)^2 == exp(2z) -> fold the 2x into the mat head.
    w_heads = jnp.concatenate([params["wv"], params["wa"], 2.0 * params["wmd"]], axis=1)
    b_heads = jnp.concatenate([params["bv"], params["ba"], 2.0 * params["bmd"]], axis=1)
    w_out = jnp.concatenate([w_heads, b_heads], axis=0)                     # (33, 1+A+diag)
    # Zero-pad the lane axis to a multiple of 128 so the output store is unmasked.
    out_w = w_out.shape[1]
    out_pad = LANE * ((out_w + LANE - 1) // LANE)
    w_out = jnp.pad(w_out, ((0, 0), (0, out_pad - out_w)))                  # (33, out_pad)
    return w_main, b_main, w_out


def grl_forward_batched(params, X, A):
    """X: (B, N, F) node features; A: (B, N, N) dense adjacencies."""
    B, N, F_in = X.shape
    n_actions = params["wa"].shape[1]
    diag_size = params["wmd"].shape[1]
    out_w = 1 + n_actions + diag_size

    w_main, b_main, w_out = _pack_params(params)
    out_pad = w_out.shape[1]
    kernel = functools.partial(_grl_kernel, n_actions)

    out = pl.pallas_call(
        kernel,
        out_shape=jax.ShapeDtypeStruct((B, N, out_pad), jnp.float32),
        grid_spec=pltpu.PrefetchScalarGridSpec(
            num_scalar_prefetch=0,
            grid=(B,),
            in_specs=[
                pl.BlockSpec((None, N, F_in), lambda b: (b, 0, 0)),
                pl.BlockSpec((None, N, N), lambda b: (b, 0, 0)),
                pl.BlockSpec(w_main.shape, lambda b: (0, 0)),   # constant block -> DMA'd once
                pl.BlockSpec(b_main.shape, lambda b: (0, 0)),
                pl.BlockSpec(w_out.shape, lambda b: (0, 0)),
            ],
            out_specs=pl.BlockSpec((None, N, out_pad), lambda b: (b, 0, 0)),
        ),
        compiler_params=pltpu.CompilerParams(dimension_semantics=("parallel",)),
    )(X, A, w_main, b_main, w_out)

    v = out[..., 0:1]                                   # (B, N, 1)
    mu = out[..., 1:1 + n_actions]                      # (B, N, A)
    mat = out[..., 1 + n_actions:out_w][..., None]      # (B, N, diag, 1) == unsqueeze(mat_diag**2, 2)
    return mu, mat, v


def grl_forward(params, X_in, A_in_Dense, RL_indice, action_low=-1.0, action_high=1.0):
    """Single-graph forward matching the PyTorch module's signature."""
    # mask = RL_indice.reshape(N, 1) is computed in the torch forward but never used
    # in the returned value; it is intentionally not part of the kernel.
    del RL_indice
    mu, mat, v = grl_forward_batched(params, X_in[None], A_in_Dense[None])
    # TODO(synk): pfrl.action_value.QuadraticActionValue wrapper (with action_low/high
    # clipping bookkeeping) has no Pallas equivalent; we return its (Mu, mat, V) fields.
    return mu[0], mat[0], v[0]


def _reference_forward(params, X_in, A_in_Dense):
    """Pure-JAX reference (unpacked params, original formulation) for correctness checking."""
    relu = lambda z: jnp.maximum(z, 0.0)
    h = relu(X_in @ params["we1"] + params["be1"])
    h = relu(h @ params["we2"] + params["be2"])
    N = X_in.shape[0]
    a_hat = jnp.where((A_in_Dense != 0.0) | jnp.eye(N, dtype=bool), 1.0, 0.0)
    d = jnp.sum(a_hat, axis=0)                     # in-degree (column sums)
    dis = 1.0 / jnp.sqrt(d)
    norm_adj = dis[:, None] * a_hat.T * dis[None, :]
    xg = norm_adj @ (h @ params["wg"]) + params["bg"]
    xg = relu(xg)
    xg = relu(xg @ params["wgd"] + params["bgd"])
    f_concat = jnp.concatenate([xg, h], axis=1)
    p = relu(f_concat @ params["wp1"] + params["bp1"])
    p = relu(p @ params["wp2"] + params["bp2"])
    v = p @ params["wv"] + params["bv"]
    mu = p @ params["wa"] + params["ba"]
    md = jnp.exp(p @ params["wmd"] + params["bmd"])
    return mu, (md * md)[:, :, None], v


if __name__ == "__main__":
    N_AGENTS = 8      # num_agent (nodes)
    N_FEATURES = 16   # per-agent feature dim F
    N_ACTIONS = 4     # A -> diag_size = 10
    BATCH = 4         # rollout batch of graphs for the batched path
    ACTION_LOW, ACTION_HIGH = -1.0, 1.0

    key = jax.random.PRNGKey(0)
    k_param, k_x, k_adj, k_bx, k_badj = jax.random.split(key, 5)

    params = init_params(k_param, N_FEATURES, N_ACTIONS)

    # --- single graph (matches the PyTorch module's forward) ---
    X_in = jax.random.normal(k_x, (N_AGENTS, N_FEATURES), jnp.float32)
    A_in_Dense = jax.random.bernoulli(k_adj, 0.4, (N_AGENTS, N_AGENTS)).astype(jnp.float32)
    RL_indice = jnp.ones((N_AGENTS,), jnp.float32)

    mu, mat, v = grl_forward(params, X_in, A_in_Dense, RL_indice, ACTION_LOW, ACTION_HIGH)
    jax.block_until_ready((mu, mat, v))

    mu_ref, mat_ref, v_ref = _reference_forward(params, X_in, A_in_Dense)
    diag_size = N_ACTIONS * (N_ACTIONS + 1) // 2
    assert mu.shape == (N_AGENTS, N_ACTIONS)
    assert mat.shape == (N_AGENTS, diag_size, 1)
    assert v.shape == (N_AGENTS, 1)
    assert jnp.allclose(mu, mu_ref, rtol=5e-3, atol=5e-3)
    assert jnp.allclose(mat, mat_ref, rtol=5e-3, atol=5e-3)
    assert jnp.allclose(v, v_ref, rtol=5e-3, atol=5e-3)

    # --- batched rollout path (grid over B graphs, "parallel" -> v7x 2nd TC) ---
    Xb = jax.random.normal(k_bx, (BATCH, N_AGENTS, N_FEATURES), jnp.float32)
    Ab = jax.random.bernoulli(k_badj, 0.4, (BATCH, N_AGENTS, N_AGENTS)).astype(jnp.float32)
    mub, matb, vb = grl_forward_batched(params, Xb, Ab)
    jax.block_until_ready((mub, matb, vb))
    for i in range(BATCH):
        mr, tr, vr = _reference_forward(params, Xb[i], Ab[i])
        assert jnp.allclose(mub[i], mr, rtol=5e-3, atol=5e-3)
        assert jnp.allclose(matb[i], tr, rtol=5e-3, atol=5e-3)
        assert jnp.allclose(vb[i], vr, rtol=5e-3, atol=5e-3)

    print("KERNEL_OK")
</pallas_src>

<mosaic_0001>
module attributes {stable_mosaic.version = 11 : i64} {
  func.func @_grl_kernel(%arg0: i32, %arg1: memref<1x8x16xf32, #tpu.memory_space<vmem>>, %arg2: memref<1x8x8xf32, #tpu.memory_space<vmem>>, %arg3: memref<208x32xf32, #tpu.memory_space<vmem>>, %arg4: memref<6x32xf32, #tpu.memory_space<vmem>>, %arg5: memref<33x128xf32, #tpu.memory_space<vmem>>, %arg6: memref<1x8x128xf32, #tpu.memory_space<vmem>>) attributes {dimension_semantics = [#tpu.dimension_semantics<parallel>], iteration_bounds = array<i64: 1>, scalar_prefetch = 0 : i64, scratch_operands = 0 : i64, tpu.core_type = #tpu.core_type<tc>, window_params = [{transform_indices = @transform_0, window_bounds = array<i64: 1, 8, 16>}, {transform_indices = @transform_1, window_bounds = array<i64: 1, 8, 8>}, {pipeline_mode = #tpu.pipeline_mode<synchronous>, transform_indices = @transform_2, window_bounds = array<i64: 208, 32>}, {pipeline_mode = #tpu.pipeline_mode<synchronous>, transform_indices = @transform_3, window_bounds = array<i64: 6, 32>}, {pipeline_mode = #tpu.pipeline_mode<synchronous>, transform_indices = @transform_4, window_bounds = array<i64: 33, 128>}, {transform_indices = @transform_5, window_bounds = array<i64: 1, 8, 128>}]} {
    %c0 = arith.constant 0 : index
    %c0_0 = arith.constant 0 : index
    %c0_1 = arith.constant 0 : index
    %0 = vector.load %arg1[%c0, %c0_0, %c0_1] : memref<1x8x16xf32, #tpu.memory_space<vmem>>, vector<1x8x16xf32>
    %1 = vector.shape_cast %0 : vector<1x8x16xf32> to vector<8x16xf32>
    %c0_2 = arith.constant 0 : index
    %c0_3 = arith.constant 0 : index
    %2 = vector.load %arg3[%c0_2, %c0_3] : memref<208x32xf32, #tpu.memory_space<vmem>>, vector<16x32xf32>
    %cst = arith.constant dense<0.000000e+00> : vector<8x32xf32>
    %3 = tpu.matmul %1, %2, %cst {dimension_numbers = #tpu.dot_dimension_numbers<[1], [0], [0], [1], [0, 0, 1, 1], [], []>} : vector<8x16xf32>, vector<16x32xf32>, vector<8x32xf32> -> vector<8x32xf32>
    %c0_4 = arith.constant 0 : index
    %c0_5 = arith.constant 0 : index
    %4 = vector.load %arg4[%c0_4, %c0_5] : memref<6x32xf32, #tpu.memory_space<vmem>>, vector<1x32xf32>
    %5 = vector.broadcast %4 : vector<1x32xf32> to vector<8x32xf32>
    %6 = arith.addf %3, %5 : vector<8x32xf32>
    %cst_6 = arith.constant 0.000000e+00 : f32
    %7 = vector.broadcast %cst_6 : f32 to vector<8x32xf32>
    %8 = arith.maximumf %6, %7 : vector<8x32xf32>
    %c16 = arith.constant 16 : index
    %c0_7 = arith.constant 0 : index
    %9 = vector.load %arg3[%c16, %c0_7] : memref<208x32xf32, #tpu.memory_space<vmem>>, vector<32x32xf32>
    %cst_8 = arith.constant dense<0.000000e+00> : vector<8x32xf32>
    %10 = tpu.matmul %8, %9, %cst_8 {dimension_numbers = #tpu.dot_dimension_numbers<[1], [0], [0], [1], [0, 0, 1, 1], [], []>} : vector<8x32xf32>, vector<32x32xf32>, vector<8x32xf32> -> vector<8x32xf32>
    %c1 = arith.constant 1 : index
    %c0_9 = arith.constant 0 : index
    %11 = vector.load %arg4[%c1, %c0_9] : memref<6x32xf32, #tpu.memory_space<vmem>>, vector<1x32xf32>
    %12 = vector.broadcast %11 : vector<1x32xf32> to vector<8x32xf32>
    %13 = arith.addf %10, %12 : vector<8x32xf32>
    %cst_10 = arith.constant 0.000000e+00 : f32
    %14 = vector.broadcast %cst_10 : f32 to vector<8x32xf32>
    %15 = arith.maximumf %13, %14 : vector<8x32xf32>
    %c0_11 = arith.constant 0 : index
    %c0_12 = arith.constant 0 : index
    %c0_13 = arith.constant 0 : index
    %16 = vector.load %arg2[%c0_11, %c0_12, %c0_13] : memref<1x8x8xf32, #tpu.memory_space<vmem>>, vector<1x8x8xf32>
    %17 = vector.shape_cast %16 : vector<1x8x8xf32> to vector<8x8xf32>
    %18 = tpu.iota {dimensions = array<i32: 0>} : vector<8x8xi32>
    %19 = tpu.iota {dimensions = array<i32: 1>} : vector<8x8xi32>
    %cst_14 = arith.constant 0.000000e+00 : f32
    %20 = vector.broadcast %cst_14 : f32 to vector<8x8xf32>
    %21 = arith.cmpf one, %17, %20 : vector<8x8xf32>
    %22 = arith.cmpi eq, %18, %19 : vector<8x8xi32>
    %23 = arith.ori %21, %22 : vector<8x8xi1>
    %cst_15 = arith.constant 1.000000e+00 : f32
    %cst_16 = arith.constant 0.000000e+00 : f32
    %24 = vector.broadcast %cst_15 : f32 to vector<8x8xf32>
    %25 = vector.broadcast %cst_16 : f32 to vector<8x8xf32>
    %26 = arith.select %23, %24, %25 : vector<8x8xi1>, vector<8x8xf32>
    %cst_17 = arith.constant 1.000000e+00 : f32
    %27 = vector.broadcast %cst_17 : f32 to vector<8x1xf32>
    %cst_18 = arith.constant dense<0.000000e+00> : vector<8x1xf32>
    %28 = tpu.matmul %26, %27, %cst_18 {dimension_numbers = #tpu.dot_dimension_numbers<[0], [0], [1], [1], [0, 1, 1, 1], [], []>} : vector<8x8xf32>, vector<8x1xf32>, vector<8x1xf32> -> vector<8x1xf32>
    %29 = math.rsqrt %28 : vector<8x1xf32>
    %c48 = arith.constant 48 : index
    %c0_19 = arith.constant 0 : index
    %30 = vector.load %arg3[%c48, %c0_19] : memref<208x32xf32, #tpu.memory_space<vmem>>, vector<32x32xf32>
    %cst_20 = arith.constant dense<0.000000e+00> : vector<8x32xf32>
    %31 = tpu.matmul %15, %30, %cst_20 {dimension_numbers = #tpu.dot_dimension_numbers<[1], [0], [0], [1], [0, 0, 1, 1], [], []>} : vector<8x32xf32>, vector<32x32xf32>, vector<8x32xf32> -> vector<8x32xf32>
    %32 = vector.broadcast %29 : vector<8x1xf32> to vector<8x32xf32>
    %33 = arith.mulf %32, %31 : vector<8x32xf32>
    %cst_21 = arith.constant dense<0.000000e+00> : vector<8x32xf32>
    %34 = tpu.matmul %26, %33, %cst_21 {dimension_numbers = #tpu.dot_dimension_numbers<[0], [0], [1], [1], [0, 1, 1, 1], [], []>} : vector<8x8xf32>, vector<8x32xf32>, vector<8x32xf32> -> vector<8x32xf32>
    %35 = vector.broadcast %29 : vector<8x1xf32> to vector<8x32xf32>
    %36 = arith.mulf %35, %34 : vector<8x32xf32>
    %c2 = arith.constant 2 : index
    %c0_22 = arith.constant 0 : index
    %37 = vector.load %arg4[%c2, %c0_22] : memref<6x32xf32, #tpu.memory_space<vmem>>, vector<1x32xf32>
    %38 = vector.broadcast %37 : vector<1x32xf32> to vector<8x32xf32>
    %39 = arith.addf %36, %38 : vector<8x32xf32>
    %cst_23 = arith.constant 0.000000e+00 : f32
    %40 = vector.broadcast %cst_23 : f32 to vector<8x32xf32>
    %41 = arith.maximumf %39, %40 : vector<8x32xf32>
    %c80 = arith.constant 80 : index
    %c0_24 = arith.constant 0 : index
    %42 = vector.load %arg3[%c80, %c0_24] : memref<208x32xf32, #tpu.memory_space<vmem>>, vector<32x32xf32>
    %cst_25 = arith.constant dense<0.000000e+00> : vector<8x32xf32>
    %43 = tpu.matmul %41, %42, %cst_25 {dimension_numbers = #tpu.dot_dimension_numbers<[1], [0], [0], [1], [0, 0, 1, 1], [], []>} : vector<8x32xf32>, vector<32x32xf32>, vector<8x32xf32> -> vector<8x32xf32>
    %c3 = arith.constant 3 : index
    %c0_26 = arith.constant 0 : index
    %44 = vector.load %arg4[%c3, %c0_26] : memref<6x32xf32, #tpu.memory_space<vmem>>, vector<1x32xf32>
    %45 = vector.broadcast %44 : vector<1x32xf32> to vector<8x32xf32>
    %46 = arith.addf %43, %45 : vector<8x32xf32>
    %cst_27 = arith.constant 0.000000e+00 : f32
    %47 = vector.broadcast %cst_27 : f32 to vector<8x32xf32>
    %48 = arith.maximumf %46, %47 : vector<8x32xf32>
    %c112 = arith.constant 112 : index
    %c0_28 = arith.constant 0 : index
    %49 = vector.load %arg3[%c112, %c0_28] : memref<208x32xf32, #tpu.memory_space<vmem>>, vector<32x32xf32>
    %cst_29 = arith.constant dense<0.000000e+00> : vector<8x32xf32>
    %50 = tpu.matmul %48, %49, %cst_29 {dimension_numbers = #tpu.dot_dimension_numbers<[1], [0], [0], [1], [0, 0, 1, 1], [], []>} : vector<8x32xf32>, vector<32x32xf32>, vector<8x32xf32> -> vector<8x32xf32>
    %c144 = arith.constant 144 : index
    %c0_30 = arith.constant 0 : index
    %51 = vector.load %arg3[%c144, %c0_30] : memref<208x32xf32, #tpu.memory_space<vmem>>, vector<32x32xf32>
    %cst_31 = arith.constant dense<0.000000e+00> : vector<8x32xf32>
    %52 = tpu.matmul %15, %51, %cst_31 {dimension_numbers = #tpu.dot_dimension_numbers<[1], [0], [0], [1], [0, 0, 1, 1], [], []>} : vector<8x32xf32>, vector<32x32xf32>, vector<8x32xf32> -> vector<8x32xf32>
    %53 = arith.addf %50, %52 : vector<8x32xf32>
    %c4 = arith.constant 4 : index
    %c0_32 = arith.constant 0 : index
    %54 = vector.load %arg4[%c4, %c0_32] : memref<6x32xf32, #tpu.memory_space<vmem>>, vector<1x32xf32>
    %55 = vector.broadcast %54 : vector<1x32xf32> to vector<8x32xf32>
    %56 = arith.addf %53, %55 : vector<8x32xf32>
    %cst_33 = arith.constant 0.000000e+00 : f32
    %57 = vector.broadcast %cst_33 : f32 to vector<8x32xf32>
    %58 = arith.maximumf %56, %57 : vector<8x32xf32>
    %c176 = arith.constant 176 : index
    %c0_34 = arith.constant 0 : index
    %59 = vector.load %arg3[%c176, %c0_34] : memref<208x32xf32, #tpu.memory_space<vmem>>, vector<32x32xf32>
    %cst_35 = arith.constant dense<0.000000e+00> : vector<8x32xf32>
    %60 = tpu.matmul %58, %59, %cst_35 {dimension_numbers = #tpu.dot_dimension_numbers<[1], [0], [0], [1], [0, 0, 1, 1], [], []>} : vector<8x32xf32>, vector<32x32xf32>, vector<8x32xf32> -> vector<8x32xf32>
    %c5 = arith.constant 5 : index
    %c0_36 = arith.constant 0 : index
    %61 = vector.load %arg4[%c5, %c0_36] : memref<6x32xf32, #tpu.memory_space<vmem>>, vector<1x32xf32>
    %62 = vector.broadcast %61 : vector<1x32xf32> to vector<8x32xf32>
    %63 = arith.addf %60, %62 : vector<8x32xf32>
    %cst_37 = arith.constant 0.000000e+00 : f32
    %64 = vector.broadcast %cst_37 : f32 to vector<8x32xf32>
    %65 = arith.maximumf %63, %64 : vector<8x32xf32>
    %c0_38 = arith.constant 0 : index
    %c0_39 = arith.constant 0 : index
    %66 = vector.load %arg5[%c0_38, %c0_39] : memref<33x128xf32, #tpu.memory_space<vmem>>, vector<32x128xf32>
    %cst_40 = arith.constant dense<0.000000e+00> : vector<8x128xf32>
    %67 = tpu.matmul %65, %66, %cst_40 {dimension_numbers = #tpu.dot_dimension_numbers<[1], [0], [0], [1], [0, 0, 1, 1], [], []>} : vector<8x32xf32>, vector<32x128xf32>, vector<8x128xf32> -> vector<8x128xf32>
    %c32 = arith.constant 32 : index
    %c0_41 = arith.constant 0 : index
    %68 = vector.load %arg5[%c32, %c0_41] : memref<33x128xf32, #tpu.memory_space<vmem>>, vector<1x128xf32>
    %69 = vector.broadcast %68 : vector<1x128xf32> to vector<8x128xf32>
    %70 = arith.addf %67, %69 : vector<8x128xf32>
    %71 = tpu.iota {dimensions = array<i32: 1>} : vector<8x128xi32>
    %c5_i32 = arith.constant 5 : i32
    %72 = vector.broadcast %c5_i32 : i32 to vector<8x128xi32>
    %73 = arith.cmpi sge, %71, %72 : vector<8x128xi32>
    %74 = math.exp %70 : vector<8x128xf32>
    %75 = arith.select %73, %74, %70 : vector<8x128xi1>, vector<8x128xf32>
    %c0_42 = arith.constant 0 : index
    %c0_43 = arith.constant 0 : index
    %c0_44 = arith.constant 0 : index
    %76 = vector.load %arg6[%c0_42, %c0_43, %c0_44] : memref<1x8x128xf32, #tpu.memory_space<vmem>>, vector<1x8x128xf32>
    %77 = vector.shape_cast %76 : vector<1x8x128xf32> to vector<8x128xf32>
    %78 = vector.shape_cast %75 : vector<8x128xf32> to vector<1x8x128xf32>
    tpu.vector_store %arg6[%c0_42, %c0_43, %c0_44], %78 {strides = array<i32>} : memref<1x8x128xf32, #tpu.memory_space<vmem>>, vector<1x8x128xf32>,
    return
  }
  func.func @transform_0(%arg0: i32) -> (i32, i32, i32) {
    %c0_i32 = arith.constant 0 : i32
    %c0_i32_0 = arith.constant 0 : i32
    %c0_i32_1 = arith.constant 0 : i32
    return %arg0, %c0_i32, %c0_i32_0 : i32, i32, i32
  }
  func.func @transform_1(%arg0: i32) -> (i32, i32, i32) {
    %c0_i32 = arith.constant 0 : i32
    %c0_i32_0 = arith.constant 0 : i32
    %c0_i32_1 = arith.constant 0 : i32
    return %arg0, %c0_i32, %c0_i32_0 : i32, i32, i32
  }
  func.func @transform_2(%arg0: i32) -> (i32, i32) {
    %c0_i32 = arith.constant 0 : i32
    %c0_i32_0 = arith.constant 0 : i32
    %c0_i32_1 = arith.constant 0 : i32
    return %c0_i32, %c0_i32_0 : i32, i32
  }
  func.func @transform_3(%arg0: i32) -> (i32, i32) {
    %c0_i32 = arith.constant 0 : i32
    %c0_i32_0 = arith.constant 0 : i32
    %c0_i32_1 = arith.constant 0 : i32
    return %c0_i32, %c0_i32_0 : i32, i32
  }
  func.func @transform_4(%arg0: i32) -> (i32, i32) {
    %c0_i32 = arith.constant 0 : i32
    %c0_i32_0 = arith.constant 0 : i32
    %c0_i32_1 = arith.constant 0 : i32
    return %c0_i32, %c0_i32_0 : i32, i32
  }
  func.func @transform_5(%arg0: i32) -> (i32, i32, i32) {
    %c0_i32 = arith.constant 0 : i32
    %c0_i32_0 = arith.constant 0 : i32
    %c0_i32_1 = arith.constant 0 : i32
    return %arg0, %c0_i32, %c0_i32_0 : i32, i32, i32
  }
}

</mosaic_0001>

<bundles_post_ra>
// kernel: tpu_custom_call.1
= control target key start
LH: loop header
LB: loop body
LE: loop exit
PB: predicated region body
PF: predicated region fallthrough
CT: control target
= control target key end

     0   :  { %v189_v2 = vlaneseq  ;;  %v1075_v3 = vmov 0.0   ;;  %vm1076_vm0 = vmmov 0   ;;  %vm29_vm1 = vcmask 130048   ;;  %s1296_s0 = inlined_call_operand.vmem [shape: f32[1,8,16], index: 0, kind: input, shape index: {}]   ;;  %s1297_s1 = inlined_call_operand.vmem [shape: f32[1,8,8], index: 1, kind: input, shape index: {}]   ;;  %s1298_s2 = inlined_call_operand.vmem [shape: f32[208,32], index: 2, kind: input, shape index: {}]   ;;  %s1299_s3 = inlined_call_operand.vmem [shape: f32[6,32], index: 3, kind: input, shape index: {}]   ;;  %s1300_s4 = inlined_call_operand.vmem [shape: f32[33,128], index: 4, kind: input, shape index: {}]   ;;  %s1301_s5 = inlined_call_operand.hbm [shape: f32[1,8,128], index: 5, kind: output, shape index: {}]  }
   0x1   :  { %v23_v0 = vld [vmem:[%s1298_s2 + $0x8] sm:$0xff]  ;;  %v22_v1 = vld [vmem:[%s1298_s2] sm:$0xff]  ;;  %949 = vmatprep.subr.mxu0 %v1075_v3  ;;  %953 = vmatprep.mubr.msk.f32.mxu0 %vm1076_vm0, %v1075_v3 }
   0x2   :  { %v21_v4 = vld [vmem:[%s1296_s0] sm:$0xff]  ;;  %v107_v6 = vld [vmem:[%s1298_s2 + $0x28] sm:$0xff]  ;;  %950 = vmatpush3.msra.mxu0 %v23_v0  ;;  %v190_v7 = vshrl.u32 %v189_v2, 7  ;;  %v1128_v8 = vand.u32 127, %v189_v2  ;;  %956 = vmatprep.subr.mxu1 %v1075_v3 }
   0x3   :  { %v188_v5 = vld [vmem:[%s1297_s1] sm:$0xff] }
   0x4   :  { %vm193_vm2 = vcmp.ne.f32.partialorder %v188_v5, 0.0 }
   0x5   :  { %10 = vsyncpa [#allocation3], 0  ;;  %951 = vmatprep.subr.mxu0 %v1075_v3  ;;  %957 = vmatpush3.msra.mxu1 %v107_v6  ;;  %vm194_vm3 = vcmp.eq.s32.totalorder %v190_v7, %v1128_v8  ;;  %v106_v10 = vld [vmem:[%s1298_s2 + $0x20] sm:$0xff]  ;;  %v105_v11 = vld [vmem:[%s1298_s2 + $0x18] sm:$0xff]  ;;  %v1077_v13 = vmov 1.0   ;;  %vm229_vm5 = vcmask 64512  }
   0x6   :  { %952 = vmatpush3.msra.mxu0 %v22_v1  ;;  %958 = vmatprep.subr.mxu1 %v1075_v3  ;;  %vm195_vm4 = vmor %vm193_vm2, %vm194_vm3  ;;  %v104_v12 = vld [vmem:[%s1298_s2 + $0x10] sm:$0xff]  ;;  %v307_v14 = vld [vmem:[%s1298_s2 + $0x48] sm:$0xff]  ;;  %vm113_vm6 = vcmask 261120   ;;  %v1078_v24 = vmov 0   ;;  %s1079_s14 = smov [#allocation2]   ;;  %vm871_vm7 = vcmp.ge.s32.totalorder %v1128_v8, 5 }
   0x7   :  { %954 = vmatmul.mubr.msk.f32.vlgmr.msra.gmra.mxu0 %vm29_vm1, %v21_v4  ;;  %964 = vmatprep.mubr.msk.f32.mxu1 %vm1076_vm0, %v1075_v3  ;;  %v196_v9 = vsel %vm195_vm4, 1.0, %v1075_v3  ;;  %v306_v16 = vld [vmem:[%s1298_s2 + $0x40] sm:$0xff]  ;;  %v305_v22 = vld [vmem:[%s1298_s2 + $0x38] sm:$0xff]  ;;  %v304_v23 = vld [vmem:[%s1298_s2 + $0x30] sm:$0xff]  ;;  %s882_s15 = sshll.u32 %s1079_s14, 4  ;;  %s883_s15 = int_to_ptr.vmem [resolvable:$true] %s882_s15 }
   0x8   :  { %967 = vmatprep.subr.mxu0 %v1075_v3  ;;  %969 = vmatprep.mubr.msk.f32.mxu0 %vm1076_vm0, %v1075_v3  ;;  %v890_v17 = vld [vmem:[%s1299_s3] ss:$0 sm:$0xff]  ;;  %v892_v28 = vld [vmem:[%s1299_s3 + $0x1] ss:$0 sm:$0xff]  ;;  %v555_v33 = vld [vmem:[%s1298_s2 + $0xa8] sm:$0xff]  ;;  %p1058_p1 = scmp.lt.s32.totalorder %s883_s15, %s883_s15 }
   0x9   :  { %197 = vxpose.xlu0.b32.start.end [1/1] (short) (narrow) %v196_v9, 8  ;;  %959 = vmatpush3.msra.mxu1 %v106_v10  ;;  %v554_v34 = vld [vmem:[%s1298_s2 + $0xa0] sm:$0xff]  ;;  %v553_v35 = vld [vmem:[%s1298_s2 + $0x98] sm:$0xff]  ;;  %v552_v36 = vld [vmem:[%s1298_s2 + $0x90] sm:$0xff] }
   0xa   :  { %960 = vmatprep.subr.mxu1 %v1075_v3  ;;  %968 = vmatpush3.msra.mxu0 %v1077_v13  ;;  %v468_v43 = vld [vmem:[%s1298_s2 + $0x68] sm:$0xff]  ;;  %v467_v44 = vld [vmem:[%s1298_s2 + $0x60] sm:$0xff]  ;;  %v466_v45 = vld [vmem:[%s1298_s2 + $0x58] sm:$0xff] }
   0xb   :  { %961 = vmatpush3.msra.mxu1 %v105_v11  ;;  %972 = vmatprep.subr.mxu0 %v1075_v3  ;;  %v465_v46 = vld [vmem:[%s1298_s2 + $0x50] sm:$0xff]  ;;  %v897_v48 = vld [vmem:[%s1299_s3 + $0x2] ss:$0 sm:$0xff]  ;;  %v551_v53 = vld [vmem:[%s1298_s2 + $0x88] sm:$0xff] }
   0xc   :  { %962 = vmatprep.subr.mxu1 %v1075_v3  ;;  %v550_v54 = vld [vmem:[%s1298_s2 + $0x80] sm:$0xff]  ;;  %v549_v55 = vld [vmem:[%s1298_s2 + $0x78] sm:$0xff]  ;;  %v548_v56 = vld [vmem:[%s1298_s2 + $0x70] sm:$0xff] }
   0xd   :  { %963 = vmatpush3.msra.mxu1 %v104_v12  ;;  %v898_v57 = vld [vmem:[%s1299_s3 + $0x3] ss:$0 sm:$0xff]  ;;  %v709_v62 = vld [vmem:[%s1298_s2 + $0xc8] sm:$0xff]  ;;  %v707_v0 = vld [vmem:[%s1298_s2 + $0xb8] sm:$0xff] }
   0xe   :  { %983 = vmatprep.subr.mxu1 %v1075_v3  ;;  %v708_v63 = vld [vmem:[%s1298_s2 + $0xc0] sm:$0xff]  ;;  %v706_v1 = vld [vmem:[%s1298_s2 + $0xb0] sm:$0xff]  ;;  %v792_v2 = vld [vmem:[%s1300_s4 + $0x18] sm:$0xff] }
   0xf   :  { %v902_v5 = vld [vmem:[%s1299_s3 + $0x4] ss:$0 sm:$0xff]  ;;  %v791_v11 = vld [vmem:[%s1300_s4 + $0x10] sm:$0xff]  ;;  %v790_v12 = vld [vmem:[%s1300_s4 + $0x8] sm:$0xff] }
  0x10   :  { %v789_v13 = vld [vmem:[%s1300_s4] sm:$0xff] }
  0x32   :  { %1048 = vset.pattern.permute.xlu0 %v1078_v24 }
  0x85   :  { %v213_v15 = vpop.trf.xlu0 }
  0x86   :  { %970 = vmatmul.mubr.msk.f32.vlgmr.msra.gmra.mxu0 %vm229_vm5, %v213_v15 }
  0x87   :  { %973 = vmatpush3.msra.mxu0 %v307_v14  ;;  %980 = vmatprep.mubr.msk.f32.mxu0 %vm1076_vm0, %v1075_v3  ;;  %v903_v14 = vld [vmem:[%s1299_s3 + $0x5] ss:$0 sm:$0xff]  ;;  %s1053_s3 = scalar_lea.vmem %s883_s15, 128 }
  0x88   :  { %974 = vmatprep.subr.mxu0 %v1075_v3  ;;  %p1054_p0 = scmp.ne.s32.totalorder %s883_s15, %s1053_s3  ;;  %p1059_p2 = scmp.lt.s32.totalorder %s1053_s3, %s1053_s3 }
  0x89   :  { %975 = vmatpush3.msra.mxu0 %v306_v16 }
  0x8a   :  { %976 = vmatprep.subr.mxu0 %v1075_v3  ;;  %p1060_p3 = por %p1059_p2, %p1058_p1 }
  0x8b   :  { %977 = vmatpush3.msra.mxu0 %v305_v22 }
  0x8c   :  { %978 = vmatprep.subr.mxu0 %v1075_v3  ;;  %p1061_p4 = pnand %p1060_p3, %p1054_p0 }
  0x8d   :  { %979 = vmatpush3.msra.mxu0 %v304_v23 }
  0x8e   :  { %999 = vmatprep.subr.mxu0 %v1075_v3 }
  0xc7   :  { %v99_v18 = vpop.f32.mrf.mxu0 }
  0xc8   :  { %v100_v19 = vadd.f32 %v890_v17, %v99_v18 }
  0xc9   :  { %v955_v20 = vpop.f32.mrf.mxu0 }
  0xca   :  { %v103_v21 = vmax.f32 %v100_v19, 0.0  ;;  %v905_v19 = vld [vmem:[%s1300_s4 + $0x20] ss:$0 sm:$0xff] }
  0xcc   :  { %965 = vmatmul.mubr.msk.f32.vlgmr.msra.gmra.mxu1 %vm113_vm6, %v103_v21 }
  0xcd   :  { %985 = vmatprep.mubr.msk.f32.mxu1 %vm1076_vm0, %v1075_v3 }
 0x146   :  { %v299_v25 = vpop.f32.mrf.mxu0 }
 0x147   :  { %1049 = vrsqrt.f32 %v299_v25 }
 0x148   :  { %v971_v26 = vpop.f32.mrf.mxu0 }
 0x154   :  { %v1050_v27 = vpop.eup %1049 }
 0x155   :  { %383 = vperm.xlu0 %1048, %v1050_v27  }
 0x18c   :  { %v183_v29 = vpop.f32.mrf.mxu1 }
 0x18d   :  { %v184_v30 = vadd.f32 %v892_v28, %v183_v29 }
 0x18e   :  { %v966_v31 = vpop.f32.mrf.mxu1 }
 0x18f   :  { %v187_v32 = vmax.f32 %v184_v30, 0.0 }
 0x191   :  { %981 = vmatmul.mubr.msk.f32.vlgmr.msra.gmra.mxu0 %vm113_vm6, %v187_v32 }
 0x192   :  { %1000 = vmatpush3.msra.mxu0 %v555_v33  ;;  %1007 = vmatprep.mubr.msk.f32.mxu0 %vm1076_vm0, %v1075_v3 }
 0x193   :  { %1001 = vmatprep.subr.mxu0 %v1075_v3 }
 0x194   :  { %1002 = vmatpush3.msra.mxu0 %v554_v34 }
 0x195   :  { %1003 = vmatprep.subr.mxu0 %v1075_v3 }
 0x196   :  { %1004 = vmatpush3.msra.mxu0 %v553_v35 }
 0x197   :  { %1005 = vmatprep.subr.mxu0 %v1075_v3 }
 0x198   :  { %1006 = vmatpush3.msra.mxu0 %v552_v36 }
 0x199   :  { %1008 = vmatmul.mubr.msk.f32.vlgmr.msra.gmra.mxu0 %vm113_vm6, %v187_v32  ;;  %1021 = vmatprep.subr.mxu0 %v1075_v3 }
 0x19a   :  { %1029 = vmatprep.mubr.msk.f32.mxu0 %vm1076_vm0, %v1075_v3  ;;  %1022 = vmatpush3.msra.mxu0 %v709_v62 }
 0x19b   :  { %1023 = vmatprep.subr.mxu0 %v1075_v3 }
 0x19c   :  { %1024 = vmatpush3.msra.mxu0 %v708_v63 }
 0x19d   :  { %1025 = vmatprep.subr.mxu0 %v1075_v3 }
 0x19e   :  { %1026 = vmatpush3.msra.mxu0 %v707_v0 }
 0x19f   :  { %1027 = vmatprep.subr.mxu0 %v1075_v3 }
 0x1a0   :  { %1028 = vmatpush3.msra.mxu0 %v706_v1 }
 0x1d0   :  { %v384_v37 = vpop.permute.xlu0 %383 }
 0x251   :  { %v377_v38 = vpop.f32.mrf.mxu0 }
 0x252   :  { %v386_v39 = vmul.f32 %v384_v37, %v377_v38 }
 0x253   :  { %v982_v40 = vpop.f32.mrf.mxu0 }
 0x254   :  { %984 = vmatpush3.msra.mxu1 %v386_v39 }
 0x255   :  { %986 = vmatmul.mubr.msk.f32.vlgmr.msra.gmra.mxu1 %vm229_vm5, %v213_v15  ;;  %988 = vmatprep.subr.mxu1 %v1075_v3 }
 0x256   :  { %996 = vmatprep.mubr.msk.f32.mxu1 %vm1076_vm0, %v1075_v3  ;;  %989 = vmatpush3.msra.mxu1 %v468_v43 }
 0x257   :  { %990 = vmatprep.subr.mxu1 %v1075_v3 }
 0x258   :  { %991 = vmatpush3.msra.mxu1 %v467_v44 }
 0x259   :  { %v622_v41 = vpop.f32.mrf.mxu0  ;;  %992 = vmatprep.subr.mxu1 %v1075_v3 }
 0x25a   :  { %993 = vmatpush3.msra.mxu1 %v466_v45 }
 0x25b   :  { %v1009_v42 = vpop.f32.mrf.mxu0  ;;  %994 = vmatprep.subr.mxu1 %v1075_v3 }
 0x25c   :  { %995 = vmatpush3.msra.mxu1 %v465_v46 }
 0x25d   :  { %1010 = vmatprep.subr.mxu1 %v1075_v3 }
 0x315   :  { %v453_v47 = vpop.f32.mrf.mxu1 }
 0x316   :  { %v457_v49 = vmul.f32 %v453_v47, %v384_v37 }
 0x317   :  { %v987_v50 = vpop.f32.mrf.mxu1 }
 0x318   :  { %v463_v51 = vadd.f32 %v897_v48, %v457_v49 }
 0x31a   :  { %v464_v52 = vmax.f32 %v463_v51, 0.0 }
 0x31c   :  { %997 = vmatmul.mubr.msk.f32.vlgmr.msra.gmra.mxu1 %vm113_vm6, %v464_v52 }
 0x31d   :  { %1011 = vmatpush3.msra.mxu1 %v551_v53  ;;  %1018 = vmatprep.mubr.msk.f32.mxu1 %vm1076_vm0, %v1075_v3 }
 0x31e   :  { %1012 = vmatprep.subr.mxu1 %v1075_v3 }
 0x31f   :  { %1013 = vmatpush3.msra.mxu1 %v550_v54 }
 0x320   :  { %1014 = vmatprep.subr.mxu1 %v1075_v3 }
 0x321   :  { %1015 = vmatpush3.msra.mxu1 %v549_v55 }
 0x322   :  { %1016 = vmatprep.subr.mxu1 %v1075_v3 }
 0x323   :  { %1017 = vmatpush3.msra.mxu1 %v548_v56 }
 0x324   :  { %1032 = vmatprep.subr.mxu1 %v1075_v3 }
 0x3dc   :  { %v543_v58 = vpop.f32.mrf.mxu1 }
 0x3dd   :  { %v544_v59 = vadd.f32 %v898_v57, %v543_v58 }
 0x3de   :  { %v998_v60 = vpop.f32.mrf.mxu1 }
 0x3df   :  { %v547_v61 = vmax.f32 %v544_v59, 0.0 }
 0x3e1   :  { %1019 = vmatmul.mubr.msk.f32.vlgmr.msra.gmra.mxu1 %vm113_vm6, %v547_v61 }
 0x3e2   :  { %1040 = vmatprep.mubr.msk.f32.mxu1 %vm1076_vm0, %v1075_v3  ;;  %1033 = vmatpush3.msra.mxu1 %v792_v2 }
 0x3e3   :  { %1034 = vmatprep.subr.mxu1 %v1075_v3 }
 0x3e4   :  { %1035 = vmatpush3.msra.mxu1 %v791_v11 }
 0x3e5   :  { %1036 = vmatprep.subr.mxu1 %v1075_v3 }
 0x3e6   :  { %1037 = vmatpush3.msra.mxu1 %v790_v12 }
 0x3e7   :  { %1038 = vmatprep.subr.mxu1 %v1075_v3 }
 0x3e8   :  { %1039 = vmatpush3.msra.mxu1 %v789_v13 }
 0x4a1   :  { %v695_v4 = vpop.f32.mrf.mxu1 }
 0x4a2   :  { %v696_v6 = vadd.f32 %v695_v4, %v622_v41 }
 0x4a3   :  { %v1020_v7 = vpop.f32.mrf.mxu1 }
 0x4a4   :  { %v704_v9 = vadd.f32 %v902_v5, %v696_v6 }
 0x4a6   :  { %v705_v10 = vmax.f32 %v704_v9, 0.0 }
 0x4a8   :  { %1030 = vmatmul.mubr.msk.f32.vlgmr.msra.gmra.mxu0 %vm113_vm6, %v705_v10 }
 0x568   :  { %v784_v15 = vpop.f32.mrf.mxu0 }
 0x569   :  { %v785_v16 = vadd.f32 %v903_v14, %v784_v15 }
 0x56a   :  { %v1031_v17 = vpop.f32.mrf.mxu0 }
 0x56b   :  { %v788_v18 = vmax.f32 %v785_v16, 0.0 }
 0x56d   :  { %1041 = vmatmul.mubr.msk.f32.vlgmr.msra.gmra.mxu1 %vm113_vm6, %v788_v18 }
 0x62d   :  { %v867_v20 = vpop.f32.mrf.mxu1 }
 0x62e   :  { %v868_v21 = vadd.f32 %v905_v19, %v867_v20 }
 0x62f   :  { %v1042_v22 = vpop.f32.mrf.mxu1 }
 0x630   :  { %v872_v23 = vmul.f32 1.442695, %v868_v21 }
 0x632   :  { %1051 = vpow2.f32 %v872_v23 }
 0x63f   :  { %v1052_v3 = vpop.eup %1051 }
 0x640   :  { %v874_v24 = vsel %vm871_vm7, %v1052_v3, %v868_v21 }
 0x641   :  { %875 = vst [vmem:[#allocation2] sm:$0xff] %v874_v24 }
 0x642   :  { %1064 = shalt.err (!%p1061_p4)
}
 0x643   :  { %885 = dma.vmem_to_hbm [thread:$0]  %s883_s15, 128, %s1301_s5, [#allocation3]  }
 0x644   :  { %1073 = dma.done.wait [#allocation3], 128  }
 0x645   :  { %1074 = vsyncadd [#allocation3], 4294967168 }
 0x646   :  { %889 = vsyncpa [#allocation3], 1 }

</bundles_post_ra>
